<compile_context>
chip_gen: v6e
topology: v6e:2x2x1
jax: 0.10.0
libtpu: 0.0.40
codegen_flags: <defaults>
</compile_context>

<pallas_src>
import functools

import jax
import jax.numpy as jnp
import numpy as np
from jax.experimental import pallas as pl
from jax.experimental.pallas import tpu as pltpu


# ----------------------------------------------------------------------------
# Static layout helpers (Python-level, resolved at trace time).
# ----------------------------------------------------------------------------
def _align(n, m):
    return ((n + m - 1) // m) * m


def _layout(I, H, O, C, S, A):
    """Offsets/shapes of the packed weight slabs and the packed recurrent-state slab."""
    if 2 * H + A > 128:
        raise ValueError("state segment (h|c|w) must fit in one 128-lane tile")
    if O + S + 1 > 128:
        raise ValueError("logits+shift+gamma must fit in one 128-lane tile")
    lanes_g = _align(max(4 * H, S * A, A * C), 128)
    # slab G (recurrent/constant matrices), rows:
    roll_off = _align(H, 8)                 # W_hh rows [0,H)
    rw_off = _align(roll_off + A, 8)        # R_roll rows [roll_off, roll_off+A)
    rows_g = _align(rw_off + A, 8)          # R_w rows [rw_off, rw_off+A)
    # slab P (fused interface + output head), columns:
    e_off = _align(O + S + 1, 128)          # [out | shift | gamma | 0-pad] -> 128
    a_off = _align(e_off + A * C, 128)
    lanes_p = _align(a_off + A * C, 128)
    rows_p = _align(H + 1, 8)               # H weight rows + 1 bias row
    # packed recurrent state: [h | c | w | 0-pad]->128 then mem_flat
    mem_off = 128
    sw = mem_off + _align(A * C, 128)
    return dict(lanes_g=lanes_g, roll_off=roll_off, rw_off=rw_off, rows_g=rows_g,
                e_off=e_off, a_off=a_off, lanes_p=lanes_p, rows_p=rows_p,
                log_lanes=e_off, mem_off=mem_off, sw=sw)


def _refined_recip(x):
    """EUP approximate reciprocal + one Newton step (~f32 exact, off the VALU)."""
    r = pl.reciprocal(x, approx=True)
    return r * (2.0 - x * r)


# ----------------------------------------------------------------------------
# Pallas kernel: one MAE-cell step per grid point; grid = (groups, time).
# ----------------------------------------------------------------------------
def _mae_seq_kernel(xw_ref, init_ref, wg_ref, wp_ref, logits_ref, state_ref,
                    *, H, O, C, S, A, L):
    f32 = jnp.float32
    mem_off, e_off, a_off = L["mem_off"], L["e_off"], L["a_off"]

    # t == 0 for this group: load the initial recurrent state into the VMEM-resident
    # final-state output block (it acts as the state register across the time axis).
    @pl.when(pl.program_id(1) == 0)
    def _():
        state_ref[...] = init_ref[...]

    st = state_ref[...]
    h_prev = st[:, 0:H]
    c_prev = st[:, H:2 * H]
    w_prev = st[:, 2 * H:2 * H + A]
    mem_prev = st[:, mem_off:mem_off + A * C]

    # ---- 1. LSTM controller.  x @ W_ih + (b_ih + b_hh) was precomputed for the whole
    #         sequence in the wrapper; only the recurrent h @ W_hh matmul is in the chain.
    gates = xw_ref[...] + jnp.dot(h_prev, wg_ref[0:H, :], preferred_element_type=f32)
    sig = jax.nn.sigmoid(gates)                       # one full-vreg sigmoid (4H = 128 lanes)
    i_g = sig[:, 0:H]
    f_g = sig[:, H:2 * H]
    o_g = sig[:, 3 * H:4 * H]
    g_g = jnp.tanh(gates[:, 2 * H:3 * H])
    c_new = f_g * c_prev + i_g * g_g
    h_new = o_g * jnp.tanh(c_new)

    # ---- 2. fused head: [logits | shift | gamma | 0 | erase tiled over A | add tiled over A]
    p_all = (jnp.dot(h_new, wp_ref[0:H, :], preferred_element_type=f32)
             + wp_ref[H:H + 1, :])
    shift_logits = p_all[:, O:O + S]
    gamma_raw = p_all[:, O + S:O + S + 1]
    e_til = jax.nn.sigmoid(p_all[:, e_off:e_off + A * C])   # already in [B, A*C] layout
    a_til = jax.nn.sigmoid(p_all[:, a_off:a_off + A * C])

    # shift softmax (approx reciprocal + Newton refinement)
    es = jnp.exp(shift_logits - jnp.max(shift_logits, axis=-1, keepdims=True))
    shift_p = es * _refined_recip(jnp.sum(es, axis=-1, keepdims=True))

    # oneplus(gamma) = softplus(gamma) + 1 (numerically stable form)
    gamma = (jnp.maximum(gamma_raw, 0.0)
             + jnp.log(1.0 + jnp.exp(-jnp.abs(gamma_raw))) + 1.0)

    # ---- circular convolution: ONE matmul against the concatenated roll matrices
    rolled = jnp.dot(w_prev, wg_ref[L["roll_off"]:L["roll_off"] + A, :],
                     preferred_element_type=f32)
    shifted = shift_p[:, 0:1] * rolled[:, 0:A]
    for s in range(1, S):
        shifted = shifted + shift_p[:, s:s + 1] * rolled[:, s * A:(s + 1) * A]

    # ---- sharpening.  EXACT normalization: w_new re-enters the recurrence every step.
    powed = jnp.exp(gamma * jnp.log(shifted + 1e-12))
    w_new = powed / jnp.sum(powed, axis=-1, keepdims=True)

    # ---- memory update in flat, lane-dense [B, A*C] layout:
    #      M = M * (1 - w e^T) + w a^T   (w expanded over C via one tiny constant matmul)
    w_rep = jnp.dot(w_new, wg_ref[L["rw_off"]:L["rw_off"] + A, :],
                    preferred_element_type=f32)[:, 0:A * C]
    mem_new = mem_prev * (1.0 - w_rep * e_til) + w_rep * a_til

    # ---- 3. outputs.  Logits: one lane-dense [B,128] store straight from the head result
    #         (lanes 0:O are the logits; the wrapper slices them out).  The recurrent state
    #         stays VMEM-resident and is written back to HBM only when the group advances.
    logits_ref[...] = p_all[:, 0:L["log_lanes"]]
    state_ref[:, 0:H] = h_new
    state_ref[:, H:2 * H] = c_new
    state_ref[:, 2 * H:2 * H + A] = w_new
    state_ref[:, mem_off:mem_off + A * C] = mem_new


# ----------------------------------------------------------------------------
# Wrappers.
# ----------------------------------------------------------------------------
def mae_cell_sequence(x_seq, init_state, packed, *, output_size, shift_size, num_groups=1):
    """Apply the MAE cell over a sequence.

    x_seq: [B, T, I];  init_state = ((h, c), (write_attention,), memory[B,A,C])
    returns (logits[B, T, O], final_state)
    """
    (h0, c0), (w0,), mem0 = init_state
    Btot, T, I = x_seq.shape
    H = h0.shape[-1]
    A, C = mem0.shape[-2], mem0.shape[-1]
    O, S = output_size, shift_size
    G = num_groups
    assert Btot % G == 0, "batch must be divisible by num_groups"
    B = Btot // G
    L = _layout(I, H, O, C, S, A)
    SW = L["sw"]
    f32 = jnp.float32

    # Input projection for the whole sequence in one XLA matmul (keeps only h @ W_hh inside
    # the recurrent chain).  Grouped + time-major for the (parallel, arbitrary) grid.
    wx = packed["wx"]
    xw = jnp.einsum("bti,ij->btj", x_seq.astype(f32), wx[0:I, :]) + wx[I, :]
    xw = jnp.transpose(xw.reshape(G, B, T, L["lanes_g"]), (0, 2, 1, 3))   # [G, T, B, lanes]

    # Pack the initial recurrent state: [G, B, SW] = [h | c | w | 0-pad | mem_flat]
    def grp(a):
        return a.reshape(G, B, -1).astype(f32)

    pieces = [grp(h0), grp(c0), grp(w0)]
    pad0 = L["mem_off"] - (2 * H + A)
    if pad0 > 0:
        pieces.append(jnp.zeros((G, B, pad0), f32))
    pieces.append(grp(mem0))
    tail = SW - (L["mem_off"] + A * C)
    if tail > 0:
        pieces.append(jnp.zeros((G, B, tail), f32))
    init_slab = jnp.concatenate(pieces, axis=-1)

    kernel = functools.partial(_mae_seq_kernel, H=H, O=O, C=C, S=S, A=A, L=L)

    logits_raw, final_slab = pl.pallas_call(
        kernel,
        grid=(G, T),
        in_specs=[
            # per-step streamed gate pre-activations
            pl.BlockSpec((None, None, B, L["lanes_g"]), lambda g, t: (g, t, 0, 0)),
            # per-group initial state (re-DMA'd only when g changes)
            pl.BlockSpec((None, B, SW), lambda g, t: (g, 0, 0)),
            # weight slabs: constant index -> VMEM-resident for the whole call
            pl.BlockSpec((L["rows_g"], L["lanes_g"]), lambda g, t: (0, 0)),
            pl.BlockSpec((L["rows_p"], L["lanes_p"]), lambda g, t: (0, 0)),
        ],
        out_specs=(
            # per-step lane-dense logits tile
            pl.BlockSpec((None, None, B, L["log_lanes"]), lambda g, t: (g, t, 0, 0)),
            # recurrent state: VMEM-resident across t, written to HBM once per group
            pl.BlockSpec((None, B, SW), lambda g, t: (g, 0, 0)),
        ),
        out_shape=(
            jax.ShapeDtypeStruct((G, T, B, L["log_lanes"]), f32),
            jax.ShapeDtypeStruct((G, B, SW), f32),
        ),
        compiler_params=pltpu.CompilerParams(
            dimension_semantics=("parallel", "arbitrary")),
    )(xw, init_slab, packed["wg"], packed["wp"])

    logits = jnp.transpose(logits_raw[:, :, :, 0:O], (0, 2, 1, 3)).reshape(Btot, T, O)
    h_f = final_slab[:, :, 0:H].reshape(Btot, H)
    c_f = final_slab[:, :, H:2 * H].reshape(Btot, H)
    w_f = final_slab[:, :, 2 * H:2 * H + A].reshape(Btot, A)
    mem_f = final_slab[:, :, L["mem_off"]:L["mem_off"] + A * C].reshape(Btot, A, C)
    return logits, ((h_f, c_f), (w_f,), mem_f)


def mae_cell_forward(x, prev_state, packed, *, output_size, shift_size, num_groups=1):
    """Single-step forward (same signature/semantics as the module's forward)."""
    logits_seq, new_state = mae_cell_sequence(
        x[:, None, :], prev_state, packed,
        output_size=output_size, shift_size=shift_size, num_groups=num_groups)
    return logits_seq[:, 0, :], new_state


# ----------------------------------------------------------------------------
# One-time packing of all weights / constants into the VMEM-resident slabs.
# ----------------------------------------------------------------------------
def pack_weights(params, *, input_size, hidden_size, output_size,
                 content_bits, shift_size, num_addr):
    I, H, O, C, S, A = input_size, hidden_size, output_size, content_bits, shift_size, num_addr
    L = _layout(I, H, O, C, S, A)

    # slab G: recurrent LSTM weights + interface constants, [rows_g, lanes_g]
    wg = np.zeros((L["rows_g"], L["lanes_g"]), np.float32)
    wg[0:H, 0:4 * H] = np.asarray(params["W_hh"], np.float32)
    roll = np.asarray(params["roll_mats"], np.float32)                 # [S, A, A]
    wg[L["roll_off"]:L["roll_off"] + A, 0:S * A] = np.concatenate(list(roll), axis=1)
    wg[L["rw_off"]:L["rw_off"] + A, 0:A * C] = np.kron(
        np.eye(A, dtype=np.float32), np.ones((1, C), np.float32))      # w -> repeat over C

    # slab P: fused head [out | shift | gamma | 0 | erase tiled over A | add tiled over A]
    wp = np.zeros((L["rows_p"], L["lanes_p"]), np.float32)
    W_p = np.asarray(params["W_p"], np.float32)
    b_p = np.asarray(params["b_p"], np.float32)[0]
    W_o = np.asarray(params["W_out"], np.float32)
    b_o = np.asarray(params["b_out"], np.float32)[0]
    wp[0:H, 0:O] = W_o;                          wp[H, 0:O] = b_o
    wp[0:H, O:O + S] = W_p[:, 0:S];              wp[H, O:O + S] = b_p[0:S]
    wp[0:H, O + S] = W_p[:, S];                  wp[H, O + S] = b_p[S]
    wp[0:H, L["e_off"]:L["e_off"] + A * C] = np.tile(W_p[:, S + 1:S + 1 + C], (1, A))
    wp[H, L["e_off"]:L["e_off"] + A * C] = np.tile(b_p[S + 1:S + 1 + C], A)
    wp[0:H, L["a_off"]:L["a_off"] + A * C] = np.tile(W_p[:, S + 1 + C:S + 1 + 2 * C], (1, A))
    wp[H, L["a_off"]:L["a_off"] + A * C] = np.tile(b_p[S + 1 + C:S + 1 + 2 * C], A)

    # input projection (applied once per sequence, outside the recurrence): [I+1, lanes_g]
    wx = np.zeros((I + 1, L["lanes_g"]), np.float32)
    wx[0:I, 0:4 * H] = np.asarray(params["W_ih"], np.float32)
    wx[I, 0:4 * H] = (np.asarray(params["b_ih"], np.float32)[0]
                      + np.asarray(params["b_hh"], np.float32)[0])

    return {"wg": jnp.asarray(wg), "wp": jnp.asarray(wp), "wx": jnp.asarray(wx)}


# ----------------------------------------------------------------------------
# Plain-JAX single-step reference (same math, unpacked params).
# ----------------------------------------------------------------------------
def mae_cell_reference(x, prev_state, params, *, shift_size):
    (h, c), (w_att,), memory = prev_state
    H = h.shape[1]
    C = memory.shape[2]
    S = shift_size

    gates = x @ params["W_ih"] + params["b_ih"] + h @ params["W_hh"] + params["b_hh"]
    i_g = jax.nn.sigmoid(gates[:, 0 * H:1 * H])
    f_g = jax.nn.sigmoid(gates[:, 1 * H:2 * H])
    g_g = jnp.tanh(gates[:, 2 * H:3 * H])
    o_g = jax.nn.sigmoid(gates[:, 3 * H:4 * H])
    c_new = f_g * c + i_g * g_g
    h_new = o_g * jnp.tanh(c_new)

    p = h_new @ params["W_p"] + params["b_p"]
    shift_p = jax.nn.softmax(p[:, 0:S], axis=-1)
    gamma_raw = p[:, S:S + 1]
    gamma = (jnp.maximum(gamma_raw, 0.0)
             + jnp.log(1.0 + jnp.exp(-jnp.abs(gamma_raw))) + 1.0)
    erase_v = jax.nn.sigmoid(p[:, S + 1:S + 1 + C])
    add_v = jax.nn.sigmoid(p[:, S + 1 + C:S + 1 + 2 * C])

    shifted = jnp.zeros_like(w_att)
    for s in range(S):
        shifted = shifted + shift_p[:, s:s + 1] * (w_att @ params["roll_mats"][s])
    powed = jnp.exp(gamma * jnp.log(shifted + 1e-12))
    w_new = powed / jnp.sum(powed, axis=-1, keepdims=True)

    w3 = w_new[:, :, None]
    mem_new = memory * (1.0 - w3 * erase_v[:, None, :]) + w3 * add_v[:, None, :]
    logits = h_new @ params["W_out"] + params["b_out"]
    return logits, ((h_new, c_new), (w_new,), mem_new)


# ----------------------------------------------------------------------------
# Deterministic parameter construction (PyTorch-style shapes, weights stored [in, out]).
# ----------------------------------------------------------------------------
def build_roll_matrices(A, S):
    start = (-S) // 2 + 1
    R = np.zeros((S, A, A), dtype=np.float32)
    for s in range(S):
        for a in range(A):
            j = (a + s + start) % A
            R[s, j, a] = 1.0
    return jnp.asarray(R)


def init_params(key, *, input_size, hidden_size, output_size, content_bits, shift_size, num_addr):
    I, H, O, C, S = input_size, hidden_size, output_size, content_bits, shift_size
    P = S + 1 + 2 * C
    ks = jax.random.split(key, 10)

    def u(k, shape, fan_in):
        lim = 1.0 / np.sqrt(fan_in)
        return jax.random.uniform(k, shape, jnp.float32, -lim, lim)

    return {
        "W_ih": u(ks[0], (I, 4 * H), H),
        "b_ih": u(ks[1], (1, 4 * H), H),
        "W_hh": u(ks[2], (H, 4 * H), H),
        "b_hh": u(ks[3], (1, 4 * H), H),
        "W_p": u(ks[4], (H, P), H),
        "b_p": u(ks[5], (1, P), H),
        "W_out": u(ks[6], (H, O), H),
        "b_out": u(ks[7], (1, O), H),
        "roll_mats": build_roll_matrices(num_addr, S),
    }


def _check(name, got, want, tol):
    err = float(jnp.max(jnp.abs(got - want)))
    assert bool(jnp.allclose(got, want, atol=tol, rtol=tol)), \
        f"{name} mismatch: max abs err {err:.3e} (tol {tol})"


if __name__ == "__main__":
    # 2 groups x 8 batch rows (full sublanes / both v7x TCs), 8 time steps.
    G, B_SUB, T = 2, 8, 8
    B_TOT = G * B_SUB
    I, O, H, A, C, S = 8, 8, 32, 16, 8, 3

    key = jax.random.PRNGKey(0)
    kp, kx, kh, kc, kw, km = jax.random.split(key, 6)

    params = init_params(kp, input_size=I, hidden_size=H, output_size=O,
                         content_bits=C, shift_size=S, num_addr=A)
    packed = pack_weights(params, input_size=I, hidden_size=H, output_size=O,
                          content_bits=C, shift_size=S, num_addr=A)

    x_seq = jax.random.normal(kx, (B_TOT, T, I), jnp.float32)
    h0 = jax.random.normal(kh, (B_TOT, H), jnp.float32) * 0.1
    c0 = jax.random.normal(kc, (B_TOT, H), jnp.float32) * 0.1
    w_raw = jax.random.uniform(kw, (B_TOT, A), jnp.float32, 0.0, 1.0)
    w0 = w_raw / jnp.sum(w_raw, axis=-1, keepdims=True)
    mem0 = jax.random.normal(km, (B_TOT, A, C), jnp.float32) * 0.1
    init_state = ((h0, c0), (w0,), mem0)

    # ---- Pallas kernel: whole sequence in one call ----
    seq_fn = jax.jit(functools.partial(
        mae_cell_sequence, output_size=O, shift_size=S, num_groups=G))
    logits_seq, ((h_f, c_f), (w_f,), mem_f) = seq_fn(x_seq, init_state, packed)
    jax.block_until_ready(logits_seq)

    # ---- Pure-JAX reference: step the cell T times ----
    st = init_state
    ref_logits = []
    for t in range(T):
        lg, st = mae_cell_reference(x_seq[:, t, :], st, params, shift_size=S)
        ref_logits.append(lg)
    ref_logits = jnp.stack(ref_logits, axis=1)
    (rh, rc), (rw,), rmem = st

    _check("logits_seq", logits_seq, ref_logits, 2e-3)
    _check("h_final", h_f, rh, 2e-3)
    _check("c_final", c_f, rc, 2e-3)
    _check("w_final", w_f, rw, 5e-3)
    _check("mem_final", mem_f, rmem, 5e-3)

    # ---- single-step path (module's forward signature) ----
    step_fn = jax.jit(functools.partial(
        mae_cell_forward, output_size=O, shift_size=S, num_groups=G))
    lg1, ((h1, c1), (w1,), m1) = step_fn(x_seq[:, 0, :], init_state, packed)
    jax.block_until_ready(lg1)
    rlg1, ((rh1, rc1), (rw1,), rm1) = mae_cell_reference(
        x_seq[:, 0, :], init_state, params, shift_size=S)
    _check("step_logits", lg1, rlg1, 1e-3)
    _check("step_h", h1, rh1, 1e-3)
    _check("step_c", c1, rc1, 1e-3)
    _check("step_w", w1, rw1, 5e-3)
    _check("step_mem", m1, rm1, 5e-3)

    print("KERNEL_OK")
</pallas_src>

<mosaic_0001>
module attributes {stable_mosaic.version = 11 : i64} {
  func.func @_mae_seq_kernel(%arg0: i32, %arg1: i32, %arg2: memref<1x1x8x128xf32, #tpu.memory_space<vmem>>, %arg3: memref<1x8x256xf32, #tpu.memory_space<vmem>>, %arg4: memref<64x128xf32, #tpu.memory_space<vmem>>, %arg5: memref<40x384xf32, #tpu.memory_space<vmem>>, %arg6: memref<1x1x8x128xf32, #tpu.memory_space<vmem>>, %arg7: memref<1x8x256xf32, #tpu.memory_space<vmem>>) attributes {dimension_semantics = [#tpu.dimension_semantics<parallel>, #tpu.dimension_semantics<arbitrary>], iteration_bounds = array<i64: 2, 8>, scalar_prefetch = 0 : i64, scratch_operands = 0 : i64, tpu.core_type = #tpu.core_type<tc>, window_params = [{transform_indices = @transform_0, window_bounds = array<i64: 1, 1, 8, 128>}, {transform_indices = @transform_1, window_bounds = array<i64: 1, 8, 256>}, {pipeline_mode = #tpu.pipeline_mode<synchronous>, transform_indices = @transform_2, window_bounds = array<i64: 64, 128>}, {pipeline_mode = #tpu.pipeline_mode<synchronous>, transform_indices = @transform_3, window_bounds = array<i64: 40, 384>}, {transform_indices = @transform_4, window_bounds = array<i64: 1, 1, 8, 128>}, {transform_indices = @transform_5, window_bounds = array<i64: 1, 8, 256>}]} {
    %c0_i32 = arith.constant 0 : i32
    %0 = arith.cmpi eq, %arg1, %c0_i32 : i32
    %1 = arith.extui %0 : i1 to i32
    %c0_i32_0 = arith.constant 0 : i32
    %2 = arith.cmpi ne, %1, %c0_i32_0 : i32
    scf.if %2 {
      %c0_45 = arith.constant 0 : index
      %c0_46 = arith.constant 0 : index
      %c0_47 = arith.constant 0 : index
      %124 = vector.load %arg3[%c0_45, %c0_46, %c0_47] : memref<1x8x256xf32, #tpu.memory_space<vmem>>, vector<1x8x256xf32>
      %125 = vector.shape_cast %124 : vector<1x8x256xf32> to vector<8x256xf32>
      %c0_48 = arith.constant 0 : index
      %c0_49 = arith.constant 0 : index
      %c0_50 = arith.constant 0 : index
      %126 = vector.load %arg7[%c0_48, %c0_49, %c0_50] : memref<1x8x256xf32, #tpu.memory_space<vmem>>, vector<1x8x256xf32>
      %127 = vector.shape_cast %126 : vector<1x8x256xf32> to vector<8x256xf32>
      %128 = vector.shape_cast %125 : vector<8x256xf32> to vector<1x8x256xf32>
      tpu.vector_store %arg7[%c0_48, %c0_49, %c0_50], %128 {strides = array<i32>} : memref<1x8x256xf32, #tpu.memory_space<vmem>>, vector<1x8x256xf32>,
    } else {
    }
    %c0 = arith.constant 0 : index
    %c0_1 = arith.constant 0 : index
    %c0_2 = arith.constant 0 : index
    %3 = vector.load %arg7[%c0, %c0_1, %c0_2] : memref<1x8x256xf32, #tpu.memory_space<vmem>>, vector<1x8x256xf32>
    %4 = vector.shape_cast %3 : vector<1x8x256xf32> to vector<8x256xf32>
    %5 = vector.extract_strided_slice %4 {offsets = [0, 0], sizes = [8, 32], strides = [1, 1]} : vector<8x256xf32> to vector<8x32xf32>
    %6 = vector.extract_strided_slice %4 {offsets = [0, 32], sizes = [8, 32], strides = [1, 1]} : vector<8x256xf32> to vector<8x32xf32>
    %7 = vector.extract_strided_slice %4 {offsets = [0, 64], sizes = [8, 16], strides = [1, 1]} : vector<8x256xf32> to vector<8x16xf32>
    %8 = vector.extract_strided_slice %4 {offsets = [0, 128], sizes = [8, 128], strides = [1, 1]} : vector<8x256xf32> to vector<8x128xf32>
    %c0_3 = arith.constant 0 : index
    %c0_4 = arith.constant 0 : index
    %c0_5 = arith.constant 0 : index
    %c0_6 = arith.constant 0 : index
    %9 = vector.load %arg2[%c0_3, %c0_4, %c0_5, %c0_6] : memref<1x1x8x128xf32, #tpu.memory_space<vmem>>, vector<1x1x8x128xf32>
    %10 = vector.shape_cast %9 : vector<1x1x8x128xf32> to vector<8x128xf32>
    %c0_7 = arith.constant 0 : index
    %c0_8 = arith.constant 0 : index
    %11 = vector.load %arg4[%c0_7, %c0_8] : memref<64x128xf32, #tpu.memory_space<vmem>>, vector<32x128xf32>
    %cst = arith.constant dense<0.000000e+00> : vector<8x128xf32>
    %12 = tpu.matmul %5, %11, %cst {dimension_numbers = #tpu.dot_dimension_numbers<[1], [0], [0], [1], [0, 0, 1, 1], [], []>} : vector<8x32xf32>, vector<32x128xf32>, vector<8x128xf32> -> vector<8x128xf32>
    %13 = arith.addf %10, %12 : vector<8x128xf32>
    %14 = arith.negf %13 : vector<8x128xf32>
    %15 = math.exp %14 : vector<8x128xf32>
    %cst_9 = arith.constant 1.000000e+00 : f32
    %16 = vector.broadcast %cst_9 : f32 to vector<8x128xf32>
    %17 = arith.addf %16, %15 : vector<8x128xf32>
    %18 = arith.divf %16, %17 : vector<8x128xf32>
    %19 = vector.extract_strided_slice %18 {offsets = [0, 0], sizes = [8, 32], strides = [1, 1]} : vector<8x128xf32> to vector<8x32xf32>
    %20 = vector.extract_strided_slice %18 {offsets = [0, 32], sizes = [8, 32], strides = [1, 1]} : vector<8x128xf32> to vector<8x32xf32>
    %21 = vector.extract_strided_slice %18 {offsets = [0, 96], sizes = [8, 32], strides = [1, 1]} : vector<8x128xf32> to vector<8x32xf32>
    %22 = vector.extract_strided_slice %13 {offsets = [0, 64], sizes = [8, 32], strides = [1, 1]} : vector<8x128xf32> to vector<8x32xf32>
    %23 = math.tanh %22 : vector<8x32xf32>
    %24 = arith.mulf %20, %6 : vector<8x32xf32>
    %25 = arith.mulf %19, %23 : vector<8x32xf32>
    %26 = arith.addf %24, %25 : vector<8x32xf32>
    %27 = math.tanh %26 : vector<8x32xf32>
    %28 = arith.mulf %21, %27 : vector<8x32xf32>
    %c0_10 = arith.constant 0 : index
    %c0_11 = arith.constant 0 : index
    %29 = vector.load %arg5[%c0_10, %c0_11] : memref<40x384xf32, #tpu.memory_space<vmem>>, vector<32x384xf32>
    %cst_12 = arith.constant dense<0.000000e+00> : vector<8x384xf32>
    %30 = tpu.matmul %28, %29, %cst_12 {dimension_numbers = #tpu.dot_dimension_numbers<[1], [0], [0], [1], [0, 0, 1, 1], [], []>} : vector<8x32xf32>, vector<32x384xf32>, vector<8x384xf32> -> vector<8x384xf32>
    %c32 = arith.constant 32 : index
    %c0_13 = arith.constant 0 : index
    %31 = vector.load %arg5[%c32, %c0_13] : memref<40x384xf32, #tpu.memory_space<vmem>>, vector<1x384xf32>
    %32 = vector.broadcast %31 : vector<1x384xf32> to vector<8x384xf32>
    %33 = arith.addf %30, %32 : vector<8x384xf32>
    %34 = vector.extract_strided_slice %33 {offsets = [0, 8], sizes = [8, 3], strides = [1, 1]} : vector<8x384xf32> to vector<8x3xf32>
    %35 = vector.extract_strided_slice %33 {offsets = [0, 11], sizes = [8, 1], strides = [1, 1]} : vector<8x384xf32> to vector<8x1xf32>
    %36 = vector.extract_strided_slice %33 {offsets = [0, 128], sizes = [8, 128], strides = [1, 1]} : vector<8x384xf32> to vector<8x128xf32>
    %37 = arith.negf %36 : vector<8x128xf32>
    %38 = math.exp %37 : vector<8x128xf32>
    %cst_14 = arith.constant 1.000000e+00 : f32
    %39 = vector.broadcast %cst_14 : f32 to vector<8x128xf32>
    %40 = arith.addf %39, %38 : vector<8x128xf32>
    %41 = arith.divf %39, %40 : vector<8x128xf32>
    %42 = vector.extract_strided_slice %33 {offsets = [0, 256], sizes = [8, 128], strides = [1, 1]} : vector<8x384xf32> to vector<8x128xf32>
    %43 = arith.negf %42 : vector<8x128xf32>
    %44 = math.exp %43 : vector<8x128xf32>
    %cst_15 = arith.constant 1.000000e+00 : f32
    %45 = vector.broadcast %cst_15 : f32 to vector<8x128xf32>
    %46 = arith.addf %45, %44 : vector<8x128xf32>
    %47 = arith.divf %45, %46 : vector<8x128xf32>
    %cst_16 = arith.constant dense<0xFF800000> : vector<8xf32>
    %48 = vector.multi_reduction <maximumf>, %34, %cst_16 [1] : vector<8x3xf32> to vector<8xf32>
    %49 = vector.shape_cast %48 : vector<8xf32> to vector<8x1xf32>
    %50 = vector.broadcast %49 : vector<8x1xf32> to vector<8x3xf32>
    %51 = arith.subf %34, %50 : vector<8x3xf32>
    %52 = math.exp %51 : vector<8x3xf32>
    %cst_17 = arith.constant dense<0.000000e+00> : vector<8xf32>
    %53 = vector.multi_reduction <add>, %52, %cst_17 [1] : vector<8x3xf32> to vector<8xf32>
    %54 = vector.shape_cast %53 : vector<8xf32> to vector<8x1xf32>
    %55 = tpu.reciprocal %54 {approx = true} : vector<8x1xf32> -> vector<8x1xf32>
    %56 = arith.mulf %54, %55 : vector<8x1xf32>
    %cst_18 = arith.constant 2.000000e+00 : f32
    %57 = vector.broadcast %cst_18 : f32 to vector<8x1xf32>
    %58 = arith.subf %57, %56 : vector<8x1xf32>
    %59 = arith.mulf %55, %58 : vector<8x1xf32>
    %60 = vector.broadcast %59 : vector<8x1xf32> to vector<8x3xf32>
    %61 = arith.mulf %52, %60 : vector<8x3xf32>
    %cst_19 = arith.constant 0.000000e+00 : f32
    %62 = vector.broadcast %cst_19 : f32 to vector<8x1xf32>
    %63 = arith.maximumf %35, %62 : vector<8x1xf32>
    %64 = math.absf %35 : vector<8x1xf32>
    %cst_20 = arith.constant 0.000000e+00 : f32
    %65 = vector.broadcast %cst_20 : f32 to vector<8x1xf32>
    %66 = arith.subf %65, %64 : vector<8x1xf32>
    %67 = math.exp %66 : vector<8x1xf32>
    %cst_21 = arith.constant 1.000000e+00 : f32
    %68 = vector.broadcast %cst_21 : f32 to vector<8x1xf32>
    %69 = arith.addf %68, %67 : vector<8x1xf32>
    %70 = math.log %69 : vector<8x1xf32>
    %71 = arith.addf %63, %70 : vector<8x1xf32>
    %cst_22 = arith.constant 1.000000e+00 : f32
    %72 = vector.broadcast %cst_22 : f32 to vector<8x1xf32>
    %73 = arith.addf %71, %72 : vector<8x1xf32>
    %c32_23 = arith.constant 32 : index
    %c0_24 = arith.constant 0 : index
    %74 = vector.load %arg4[%c32_23, %c0_24] : memref<64x128xf32, #tpu.memory_space<vmem>>, vector<16x128xf32>
    %cst_25 = arith.constant dense<0.000000e+00> : vector<8x128xf32>
    %75 = tpu.matmul %7, %74, %cst_25 {dimension_numbers = #tpu.dot_dimension_numbers<[1], [0], [0], [1], [0, 0, 1, 1], [], []>} : vector<8x16xf32>, vector<16x128xf32>, vector<8x128xf32> -> vector<8x128xf32>
    %76 = vector.extract_strided_slice %61 {offsets = [0, 0], sizes = [8, 1], strides = [1, 1]} : vector<8x3xf32> to vector<8x1xf32>
    %77 = vector.extract_strided_slice %75 {offsets = [0, 0], sizes = [8, 16], strides = [1, 1]} : vector<8x128xf32> to vector<8x16xf32>
    %78 = vector.broadcast %76 : vector<8x1xf32> to vector<8x16xf32>
    %79 = arith.mulf %78, %77 : vector<8x16xf32>
    %80 = vector.extract_strided_slice %61 {offsets = [0, 1], sizes = [8, 1], strides = [1, 1]} : vector<8x3xf32> to vector<8x1xf32>
    %81 = vector.extract_strided_slice %75 {offsets = [0, 16], sizes = [8, 16], strides = [1, 1]} : vector<8x128xf32> to vector<8x16xf32>
    %82 = vector.broadcast %80 : vector<8x1xf32> to vector<8x16xf32>
    %83 = arith.mulf %82, %81 : vector<8x16xf32>
    %84 = arith.addf %79, %83 : vector<8x16xf32>
    %85 = vector.extract_strided_slice %61 {offsets = [0, 2], sizes = [8, 1], strides = [1, 1]} : vector<8x3xf32> to vector<8x1xf32>
    %86 = vector.extract_strided_slice %75 {offsets = [0, 32], sizes = [8, 16], strides = [1, 1]} : vector<8x128xf32> to vector<8x16xf32>
    %87 = vector.broadcast %85 : vector<8x1xf32> to vector<8x16xf32>
    %88 = arith.mulf %87, %86 : vector<8x16xf32>
    %89 = arith.addf %84, %88 : vector<8x16xf32>
    %cst_26 = arith.constant 9.99999996E-13 : f32
    %90 = vector.broadcast %cst_26 : f32 to vector<8x16xf32>
    %91 = arith.addf %89, %90 : vector<8x16xf32>
    %92 = math.log %91 : vector<8x16xf32>
    %93 = vector.broadcast %73 : vector<8x1xf32> to vector<8x16xf32>
    %94 = arith.mulf %93, %92 : vector<8x16xf32>
    %95 = math.exp %94 : vector<8x16xf32>
    %cst_27 = arith.constant dense<0.000000e+00> : vector<8xf32>
    %96 = vector.multi_reduction <add>, %95, %cst_27 [1] : vector<8x16xf32> to vector<8xf32>
    %97 = vector.shape_cast %96 : vector<8xf32> to vector<8x1xf32>
    %98 = vector.broadcast %97 : vector<8x1xf32> to vector<8x16xf32>
    %99 = arith.divf %95, %98 : vector<8x16xf32>
    %c48 = arith.constant 48 : index
    %c0_28 = arith.constant 0 : index
    %100 = vector.load %arg4[%c48, %c0_28] : memref<64x128xf32, #tpu.memory_space<vmem>>, vector<16x128xf32>
    %cst_29 = arith.constant dense<0.000000e+00> : vector<8x128xf32>
    %101 = tpu.matmul %99, %100, %cst_29 {dimension_numbers = #tpu.dot_dimension_numbers<[1], [0], [0], [1], [0, 0, 1, 1], [], []>} : vector<8x16xf32>, vector<16x128xf32>, vector<8x128xf32> -> vector<8x128xf32>
    %102 = arith.mulf %101, %41 : vector<8x128xf32>
    %cst_30 = arith.constant 1.000000e+00 : f32
    %103 = vector.broadcast %cst_30 : f32 to vector<8x128xf32>
    %104 = arith.subf %103, %102 : vector<8x128xf32>
    %105 = arith.mulf %8, %104 : vector<8x128xf32>
    %106 = arith.mulf %101, %47 : vector<8x128xf32>
    %107 = arith.addf %105, %106 : vector<8x128xf32>
    %108 = vector.extract_strided_slice %33 {offsets = [0, 0], sizes = [8, 128], strides = [1, 1]} : vector<8x384xf32> to vector<8x128xf32>
    %c0_31 = arith.constant 0 : index
    %c0_32 = arith.constant 0 : index
    %c0_33 = arith.constant 0 : index
    %c0_34 = arith.constant 0 : index
    %109 = vector.load %arg6[%c0_31, %c0_32, %c0_33, %c0_34] : memref<1x1x8x128xf32, #tpu.memory_space<vmem>>, vector<1x1x8x128xf32>
    %110 = vector.shape_cast %109 : vector<1x1x8x128xf32> to vector<8x128xf32>
    %111 = vector.shape_cast %108 : vector<8x128xf32> to vector<1x1x8x128xf32>
    tpu.vector_store %arg6[%c0_31, %c0_32, %c0_33, %c0_34], %111 {strides = array<i32>} : memref<1x1x8x128xf32, #tpu.memory_space<vmem>>, vector<1x1x8x128xf32>,
    %c0_35 = arith.constant 0 : index
    %c0_36 = arith.constant 0 : index
    %c0_37 = arith.constant 0 : index
    %112 = vector.load %arg7[%c0_35, %c0_36, %c0_37] : memref<1x8x256xf32, #tpu.memory_space<vmem>>, vector<1x8x32xf32>
    %113 = vector.shape_cast %112 : vector<1x8x32xf32> to vector<8x32xf32>
    %114 = vector.shape_cast %28 : vector<8x32xf32> to vector<1x8x32xf32>
    tpu.vector_store %arg7[%c0_35, %c0_36, %c0_37], %114 {strides = array<i32>} : memref<1x8x256xf32, #tpu.memory_space<vmem>>, vector<1x8x32xf32>,
    %c0_38 = arith.constant 0 : index
    %c0_39 = arith.constant 0 : index
    %c32_40 = arith.constant 32 : index
    %115 = vector.load %arg7[%c0_38, %c0_39, %c32_40] : memref<1x8x256xf32, #tpu.memory_space<vmem>>, vector<1x8x32xf32>
    %116 = vector.shape_cast %115 : vector<1x8x32xf32> to vector<8x32xf32>
    %117 = vector.shape_cast %26 : vector<8x32xf32> to vector<1x8x32xf32>
    tpu.vector_store %arg7[%c0_38, %c0_39, %c32_40], %117 {strides = array<i32>} : memref<1x8x256xf32, #tpu.memory_space<vmem>>, vector<1x8x32xf32>,
    %c0_41 = arith.constant 0 : index
    %c0_42 = arith.constant 0 : index
    %c64 = arith.constant 64 : index
    %118 = vector.load %arg7[%c0_41, %c0_42, %c64] : memref<1x8x256xf32, #tpu.memory_space<vmem>>, vector<1x8x16xf32>
    %119 = vector.shape_cast %118 : vector<1x8x16xf32> to vector<8x16xf32>
    %120 = vector.shape_cast %99 : vector<8x16xf32> to vector<1x8x16xf32>
    tpu.vector_store %arg7[%c0_41, %c0_42, %c64], %120 {strides = array<i32>} : memref<1x8x256xf32, #tpu.memory_space<vmem>>, vector<1x8x16xf32>,
    %c0_43 = arith.constant 0 : index
    %c0_44 = arith.constant 0 : index
    %c128 = arith.constant 128 : index
    %121 = vector.load %arg7[%c0_43, %c0_44, %c128] : memref<1x8x256xf32, #tpu.memory_space<vmem>>, vector<1x8x128xf32>
    %122 = vector.shape_cast %121 : vector<1x8x128xf32> to vector<8x128xf32>
    %123 = vector.shape_cast %107 : vector<8x128xf32> to vector<1x8x128xf32>
    tpu.vector_store %arg7[%c0_43, %c0_44, %c128], %123 {strides = array<i32>} : memref<1x8x256xf32, #tpu.memory_space<vmem>>, vector<1x8x128xf32>,
    return
  }
  func.func @transform_0(%arg0: i32, %arg1: i32) -> (i32, i32, i32, i32) {
    %c0_i32 = arith.constant 0 : i32
    %c0_i32_0 = arith.constant 0 : i32
    %c0_i32_1 = arith.constant 0 : i32
    return %arg0, %arg1, %c0_i32, %c0_i32_0 : i32, i32, i32, i32
  }
  func.func @transform_1(%arg0: i32, %arg1: i32) -> (i32, i32, i32) {
    %c0_i32 = arith.constant 0 : i32
    %c0_i32_0 = arith.constant 0 : i32
    %c0_i32_1 = arith.constant 0 : i32
    return %arg0, %c0_i32, %c0_i32_0 : i32, i32, i32
  }
  func.func @transform_2(%arg0: i32, %arg1: i32) -> (i32, i32) {
    %c0_i32 = arith.constant 0 : i32
    %c0_i32_0 = arith.constant 0 : i32
    %c0_i32_1 = arith.constant 0 : i32
    return %c0_i32, %c0_i32_0 : i32, i32
  }
  func.func @transform_3(%arg0: i32, %arg1: i32) -> (i32, i32) {
    %c0_i32 = arith.constant 0 : i32
    %c0_i32_0 = arith.constant 0 : i32
    %c0_i32_1 = arith.constant 0 : i32
    return %c0_i32, %c0_i32_0 : i32, i32
  }
  func.func @transform_4(%arg0: i32, %arg1: i32) -> (i32, i32, i32, i32) {
    %c0_i32 = arith.constant 0 : i32
    %c0_i32_0 = arith.constant 0 : i32
    %c0_i32_1 = arith.constant 0 : i32
    return %arg0, %arg1, %c0_i32, %c0_i32_0 : i32, i32, i32, i32
  }
  func.func @transform_5(%arg0: i32, %arg1: i32) -> (i32, i32, i32) {
    %c0_i32 = arith.constant 0 : i32
    %c0_i32_0 = arith.constant 0 : i32
    %c0_i32_1 = arith.constant 0 : i32
    return %arg0, %c0_i32, %c0_i32_0 : i32, i32, i32
  }
}

</mosaic_0001>

<bundles_post_ra>
// kernel: mae_cell_sequence.1
= control target key start
LH: loop header
LB: loop body
LE: loop exit
PB: predicated region body
PF: predicated region fallthrough
CT: control target
= control target key end

     0   :  { %s1208_s18 = smov 0   ;;  %s1210_s19 = smov 0   ;;  %s1398_s0 = inlined_call_operand.vmem [shape: f32[2,8,8,128], index: 0, kind: input, shape index: {}]   ;;  %s1399_s1 = inlined_call_operand.vmem [shape: f32[2,8,256], index: 1, kind: input, shape index: {}]   ;;  %s1400_s2 = inlined_call_operand.vmem [shape: f32[64,128], index: 2, kind: input, shape index: {}]   ;;  %s1401_s3 = inlined_call_operand.vmem [shape: f32[40,384], index: 3, kind: input, shape index: {}]   ;;  %s1402_s4 = inlined_call_operand.vmem [shape: f32[2,8,8,128], index: 4, kind: output, shape index: {0}]   ;;  %s1403_s5 = inlined_call_operand.vmem [shape: f32[2,8,256], index: 5, kind: output, shape index: {1}]  }
   0x1   :  { %s1212_s20 = smov 0   ;;  %s1214_s21 = smov 0  }
   0x2   :  { %s1216_s22 = smov 0  }
   0x3 LB: > { %s25_s23 = sadd.s32 1, %s1157_s20  ;;  %s28_s24 = sadd.s32 1, %s1161_s21  ;;  %s1165_s22 = sphi %s1216_s22, %s16_s22   ;;  %s1161_s21 = sphi %s1214_s21, %s1407_s21   ;;  %s1157_s20 = sphi %s1212_s20, %s1406_s20   ;;  %s1153_s19 = sphi %s1210_s19, %s1405_s19   ;;  %s1149_s18 = sphi %s1208_s18, %s1404_s18  }
   0x4   : > { %p26_p0 = scmp.ge.s32.totalorder %s25_s23, 8  ;;  %p966_p1 = scmp.ge.s32.totalorder %s1165_s22, 1 }
   0x5   : > { %p219_p2 = scmp.lt.s32.totalorder %s1165_s22, 17 }
   0x6   : > { %s1409_s23 = smov (%p26_p0, %s25_s23), 0  ;;  %s1411_s24 = smov (!%p26_p0, %s28_s24), %s1161_s21 }
   0x7   : > { %p220_p3 = pnand %p966_p1, %p219_p2  ;;  %p30_p4 = scmp.ge.s32.totalorder %s1411_s24, 2 }
   0x8   : > { %p263_p5 = scmp.lt.s32.totalorder (!%p220_p3), %s1153_s19, 1  ;;  %p265_p6 = scmp.lt.s32.totalorder (!%p220_p3), %s1149_s18, 7 }
   0x9   : > { %s1413_s24 = smov (%p30_p4, %s1411_s24), 0  ;;  %223 = sbr.rel (%p220_p3) target bundleno = 1993 (0x7c9), region = 36 }
   0xa   : > { %p975_p7 = scmp.ne.s32.totalorder (!%p220_p3), %s1149_s18, 0 }
   0xe   : > { %s1415_s19 = smov (!%p263_p5, %s1153_s19), 1 }
   0xf   : > { %s266_s25 = scalar_select %p265_p6, %s1149_s18, 7 }
  0x10   : > { %s967_s26 = sshll.u32 %s1415_s19, 3  ;;  %s987_s27 = sshll.u32 %s1415_s19, 4 }
  0x11   : > { %s268_s28 = sadd.s32 %s967_s26, %s266_s25  ;;  %s275_s6 = scalar_lea.vmem %s1399_s1, %s987_s27 }
  0x12   : > { %s968_s7 = sshll.u32 %s268_s28, 3  ;;  %s1244_s10 = scalar_lea.vmem %s1403_s5, %s987_s27 }
  0x13   : > { %s270_s13 = scalar_lea.vmem %s1398_s0, %s968_s7  ;;  %s1252_s16 = scalar_lea.vmem %s1402_s4, %s968_s7 }
  0x14   : > { %292 = sbr.rel (%p975_p7) target bundleno = 27 (0x1b), region = 40 }
  0x19   : > { %v293_v0 = vld [vmem:[%s275_s6] sm:$0xff]  ;;  %v294_v1 = vld [vmem:[%s275_s6 + $0x8] sm:$0xff] }
  0x1a   : > { %295 = vst [vmem:[%s1244_s10] sm:$0xff] %v293_v0  ;;  %296 = vst [vmem:[%s1244_s10 + $0x8] sm:$0xff] %v294_v1 }
  0x1b PF: > { %v303_v2 = vld [vmem:[%s1400_s2 + $0x18] sm:$0xff]  ;;  %v1167_v3 = vmov 0.0   ;;  %v302_v4 = vld [vmem:[%s1400_s2 + $0x10] sm:$0xff]  ;;  %vm1168_vm0 = vmmov 0   ;;  %v301_v5 = vld [vmem:[%s1400_s2 + $0x8] sm:$0xff]  ;;  %vm304_vm1 = vcmask 261120   ;;  %v418_v38 = vlaneseq }
  0x1c   : > { %1005 = vmatprep.subr.mxu0 %v1167_v3  ;;  %1013 = vmatprep.mubr.msk.f32.mxu0 %vm1168_vm0, %v1167_v3  ;;  %v300_v6 = vld [vmem:[%s1400_s2] sm:$0xff]  ;;  %s1169_s30 = smov 64   ;;  %s1170_s6 = smov 32   ;;  %v413_v22 = vld [vmem:[%s1401_s3 + $0x50] sm:$0xff]  ;;  %v412_v23 = vld [vmem:[%s1401_s3 + $0x48] sm:$0xff]  ;;  %vm823_vm2 = vcmask 523520  }
  0x1d   : > { %1006 = vmatpush3.msra.mxu0 %v303_v2  ;;  %502 = vmatprep.mubr.f32.mxu1 %v1167_v3  ;;  %v299_v8 = vld [vmem:[%s270_s13] sm:$0xff]  ;;  %v414_v24 = vld [vmem:[%s1401_s3 + $0x58] sm:$0xff]  ;;  %v409_v26 = vld [vmem:[%s1401_s3 + $0x30] sm:$0xff]  ;;  %v1332_v39 = vshrl.u32 %v418_v38, 7  ;;  %vm591_vm3 = vcmask 89152   ;;  %vm625_vm4 = vcmask 130048  }
  0x1e   : > { %1007 = vmatprep.subr.mxu0 %v1167_v3  ;;  %462 = vmatprep.subr.mxu1 %v413_v22  ;;  %v410_v25 = vld [vmem:[%s1401_s3 + $0x38] sm:$0xff]  ;;  %v411_v27 = vld [vmem:[%s1401_s3 + $0x40] sm:$0xff]  ;;  %v408_v29 = vld [vmem:[%s1401_s3 + $0x28] sm:$0xff]  ;;  %vm602_vm5 = vcmask 23552   ;;  %v1172_v57 = vmov 10   ;;  %v1173_v58 = vmov 9  }
  0x1f   : > { %1008 = vmatpush3.msra.mxu0 %v302_v4  ;;  %463 = vmatpush1.msra.mxu1 %v412_v23  ;;  %v407_v28 = vld [vmem:[%s1401_s3 + $0x20] sm:$0xff]  ;;  %v406_v30 = vld [vmem:[%s1401_s3 + $0x18] sm:$0xff]  ;;  %v404_v31 = vld [vmem:[%s1401_s3 + $0x8] sm:$0xff]  ;;  %v420_v40 = vsub.s32 0, %v1332_v39  ;;  %s1176_s27 = smov 112   ;;  %s1177_s28 = smov 96  }
  0x20   : > { %1009 = vmatprep.subr.mxu0 %v1167_v3  ;;  %464 = vmatprep.subr.mxu1 %v410_v25  ;;  %v405_v32 = vld [vmem:[%s1401_s3 + $0x10] sm:$0xff]  ;;  %v403_v33 = vld [vmem:[%s1401_s3] sm:$0xff]  ;;  %v622_v48 = vld [vmem:[%s1400_s2 + $0x28] sm:$0xff]  ;;  %vm828_vm6 = vcmask 654848  }
  0x21   : > { %1010 = vmatpush3.msra.mxu0 %v301_v5  ;;  %v297_v7 = vld [vmem:[%s1244_s10] sm:$0xff]  ;;  %465 = vmatpush1.msra.mxu1 %v409_v26  ;;  %v1174_v5 = vmov 8  }
  0x22   : > { %1011 = vmatprep.subr.mxu0 %v1167_v3  ;;  %466 = vmatprep.subr.mxu1 %v407_v28  ;;  %v1338_v41 = vld [vmem:[%s1401_s3 + $0x60] ss:$8 sm:$0x7] }
  0x23   : > { %1012 = vmatpush3.msra.mxu0 %v300_v6  ;;  %467 = vmatpush1.msra.mxu1 %v406_v30  ;;  %v421_v42 = vrot.slane %v1338_v41, %v420_v40  ;;  %v621_v49 = vld [vmem:[%s1400_s2 + $0x20] sm:$0xff]  ;;  %v1175_v6 = vmov 11  }
  0x24   : > { %1014 = vmatmul.mubr.msk.f32.vlgmr.msra.gmra.mxu0 %vm304_vm1, %v297_v7  ;;  %1016 = vmatprep.subr.mxu0 %v1167_v3 }
  0x25   : > { %1024 = vmatprep.mubr.msk.f32.mxu0 %vm1168_vm0, %v1167_v3  ;;  %1017 = vmatpush3.msra.mxu0 %v414_v24 }
  0x26   : > { %1018 = vmatprep.subr.mxu0 %v1167_v3  ;;  %468 = vmatprep.subr.mxu1 %v404_v31 }
  0x27   : > { %1019 = vmatpush3.msra.mxu0 %v411_v27  ;;  %469 = vmatpush1.msra.mxu1 %v403_v33 }
  0x28   : > { %1020 = vmatprep.subr.mxu0 %v1167_v3  ;;  %1027 = vmatprep.subr.mxu1 %v1167_v3 }
  0x29   : > { %1021 = vmatpush3.msra.mxu0 %v408_v29  ;;  %1093 = vset.pattern.permute.xlu1 %v1172_v57 }
  0x2a   : > { %1022 = vmatprep.subr.mxu0 %v1167_v3  ;;  %1092 = vset.pattern.permute.xlu0 %v1173_v58 }
  0x2b   : > { %1023 = vmatpush3.msra.mxu0 %v405_v32 }
  0xe4   : > { %v374_v9 = vpop.f32.mrf.mxu0 }
  0xe5   : > { %v378_v10 = vadd.f32 %v374_v9, %v299_v8 }
  0xe6   : > { %v1015_v11 = vpop.f32.mrf.mxu0 }
  0xe7   : > { %1097 = vtanh.f32 %v378_v10  ;;  %v977_v13 = vmul.f32 -1.442695, %v378_v10 }
  0xe9   : > { %1099 = vpow2.f32 %v977_v13 }
  0xf4   : > { %v1098_v12 = vpop.eup %1097 }
  0xf5   : > { %388 = vrot.lane.b32.xlu0 %v1098_v12, %s1169_s30 }
  0xf6   : > { %v1100_v14 = vpop.eup %1099 }
  0xf7   : > { %v382_v15 = vadd.f32 1.0, %v1100_v14 }
  0xf9   : > { %1101 = vrcp.f32 %v382_v15 }
 0x106   : > { %v1102_v16 = vpop.eup %1101 }
 0x107   : > { %v386_v19 = vmul.f32 %v1102_v16, %v297_v7 }
 0x167   : > { %v389_v17 = vpop.permute.xlu0 %388 }
 0x168   : > { %v391_v18 = vmul.f32 %v1102_v16, %v389_v17 }
 0x16a   : > { %393 = vrot.lane.b32.xlu0 %v391_v18, %s1170_s6 }
 0x1dc   : > { %v394_v20 = vpop.permute.xlu0 %393 }
 0x1dd   : > { %v396_v21 = vadd.f32 %v394_v20, %v386_v19 }
 0x1df   : > { %1103 = vtanh.f32 %v396_v21 }
 0x1ec   : > { %v1104_v34 = vpop.eup %1103 }
 0x1ed   : > { %399 = vrot.lane.b32.xlu1 %v1104_v34, %s1169_s30 }
 0x25f   : > { %v400_v35 = vpop.permute.xlu1 %399 }
 0x260   : > { %v402_v36 = vmul.f32 %v1102_v16, %v400_v35  ;;  %v741_v35 = vld [vmem:[%s1400_s2 + $0x38] sm:$0xff] }
 0x262   : > { %434 = vrot.lane.b32.xlu1 %v402_v36, %s1170_s6  ;;  %v740_v36 = vld [vmem:[%s1400_s2 + $0x30] sm:$0xff] }
 0x266   : > { %623 = vrot.lane.b32.xlu1 %v297_v7, %s1169_s30 }
 0x2d4   : > { %v435_v37 = vpop.permute.xlu1 %434 }
 0x2d5   : > { %822 = vst.msk [vmem:[%s1244_s10] sm:$0xff] %vm304_vm1, %v435_v37  ;;  %979 = vmatmul.mubr.msk.f32.vlgmr.msra.gmra.mxu1 %vm304_vm1, %v435_v37  ;;  %1025 = vmatmul.mubr.msk.f32.vlgmr.msra.gmra.mxu0 %vm304_vm1, %v435_v37 }
 0x2d6   : > { %1031 = vmatprep.mubr.msk.f32.mxu1 %vm1168_vm0, %v1167_v3  ;;  %824 = vst.msk [vmem:[%s1244_s10] sm:$0xff] %vm823_vm2, %v396_v21  ;;  %1028 = vmatpush3.msra.mxu1 %v622_v48 }
 0x2d7   : > { %1029 = vmatprep.subr.mxu1 %v1167_v3 }
 0x2d8   : > { %v624_v50 = vpop.permute.xlu1 %623  ;;  %1030 = vmatpush3.msra.mxu1 %v621_v49 }
 0x2d9   : > { %1032 = vmatmul.mubr.msk.f32.vlgmr.msra.gmra.mxu1 %vm625_vm4, %v624_v50  ;;  %1034 = vmatprep.subr.mxu1 %v1167_v3 }
 0x2da   : > { %1038 = vmatprep.mubr.msk.f32.mxu1 %vm1168_vm0, %v1167_v3  ;;  %1035 = vmatpush3.msra.mxu1 %v741_v35 }
 0x2db   : > { %1036 = vmatprep.subr.mxu1 %v1167_v3 }
 0x2dc   : > { %1037 = vmatpush3.msra.mxu1 %v740_v36 }
 0x395   : > { %v504_v43 = vpop.f32.mrf.mxu1  ;;  %v1341_v44 = vpop.f32.mrf.mxu0 }
 0x396   : > { %v1343_v45 = vadd.f32 %v504_v43, %v421_v42  ;;  %v424_v43 = vsub.s32 1, %v1332_v39 }
 0x397   : > { %v1026_v46 = vpop.f32.mrf.mxu0  ;;  %v1360_v59 = vpop.f32.mrf.mxu1 }
 0x398   : > { %820 = vst [vmem:[%s1252_s16] sm:$0xff] %v1343_v45  ;;  %v592_v47 = vsel %vm591_vm3, %v1343_v45, -inf  ;;  %s1171_s16 = smov 120   ;;  %v612_v7 = vand.u32 2147483647, %v1343_v45  ;;  %v611_v17 = vmax.f32 %v1343_v45, 0.0  ;;  %v425_v46 = vrot.slane %v1338_v41, %v424_v43 }
 0x399   : > { %593 = vmax.xlane.f32.xlu0 %v592_v47  ;;  %v694_v60 = vpop.f32.mrf.mxu1 }
 0x39a   : > { %v613_v8 = vsub.f32 0.0, %v612_v7  ;;  %v507_v47 = vadd.f32 %v1360_v59, %v425_v46 }
 0x39b   : > { %v1033_v61 = vpop.f32.mrf.mxu1 }
 0x39c   : > { %v614_v9 = vmul.f32 1.442695, %v613_v8  ;;  %v981_v49 = vmul.f32 -1.442695, %v507_v47 }
 0x422   : > { %v594_v51 = vpop.xlane.xlu0 %593 }
 0x423   : > { %v595_v52 = vsub.f32 %v1343_v45, %v594_v51  ;;  %v428_v45 = vsub.s32 2, %v1332_v39 }
 0x425   : > { %v596_v53 = vmul.f32 1.442695, %v595_v52  ;;  %v429_v3 = vrot.slane %v1338_v41, %v428_v45  ;;  %v298_v41 = vld [vmem:[%s1244_s10 + $0x8] sm:$0xff] }
 0x427   : > { %1105 = vpow2.f32 %v596_v53  ;;  %v576_v48 = vadd.f32 %v1341_v44, %v429_v3 }
 0x429   : > { %v982_v50 = vmul.f32 -1.442695, %v576_v48 }
 0x434   : > { %v1106_v54 = vpop.eup %1105 }
 0x435   : > { %599 = vrot.lane.b32.xlu1 %v1106_v54, %s1171_s16 }
 0x4a7   : > { %v600_v55 = vpop.permute.xlu1 %599 }
 0x4a8   : > { %v603_v56 = vsel %vm602_vm5, %v600_v55, 0.0 }
 0x4a9   : > { %604 = vadd.xlane.f32.xlu1 %v603_v56 }
 0x532   : > { %v605_v62 = vpop.xlane.xlu1 %604 }
 0x533   : > { %1107 = vrcp.f32 %v605_v62 }
 0x534   : > { %1109 = vpow2.f32 %v614_v9 }
 0x540   : > { %v1108_v63 = vpop.eup %1107 }
 0x541   : > { %v607_v0 = vmul.f32 %v1108_v63, %v605_v62  ;;  %v1110_v10 = vpop.eup %1109 }
 0x542   : > { %v616_v11 = vadd.f32 1.0, %v1110_v10 }
 0x543   : > { %v608_v1 = vsub.f32 2.0, %v607_v0 }
 0x544   : > { %1111 = vlog2.f32 %v616_v11 }
 0x545   : > { %v609_v2 = vmul.f32 %v1108_v63, %v608_v1 }
 0x547   : > { %v610_v4 = vmul.f32 %v1106_v54, %v609_v2 }
 0x549   : > { %715 = vperm.xlu1 %1093, %v610_v4   ;;  %705 = vperm.xlu0 %1092, %v610_v4  }
 0x54d   : > { %1094 = vset.pattern.permute.xlu1 %v1174_v5  ;;  %1096 = vset.pattern.permute.xlu0 %v1175_v6 }
 0x54e   : > { %700 = vperm.xlu1 %1094, %v610_v4  }
 0x551   : > { %v1112_v12 = vpop.eup %1111 }
 0x552   : > { %1095 = vset.pattern.permute.xlu1 %v1175_v6  ;;  %v618_v15 = vmul.f32 0.6931472, %v1112_v12 }
 0x554   : > { %v619_v19 = vadd.f32 %v618_v15, %v611_v17 }
 0x556   : > { %v620_v20 = vadd.f32 1.0, %v619_v19 }
 0x5c4   : > { %v706_v13 = vpop.permute.xlu0 %705  ;;  %v716_v16 = vpop.permute.xlu1 %715 }
 0x5c5   : > { %v708_v14 = vmul.f32 %v706_v13, %v694_v60  ;;  %v718_v18 = vmul.f32 %v716_v16, %v694_v60 }
 0x5c7   : > { %710 = vrot.lane.b32.xlu1 %v708_v14, %s1176_s27 }
 0x5c9   : > { %v701_v21 = vpop.permute.xlu1 %700 }
 0x5ca   : > { %v703_v23 = vmul.f32 %v701_v21, %v694_v60 }
 0x5cb   : > { %720 = vrot.lane.b32.xlu1 %v718_v18, %s1177_s28 }
 0x5cf   : > { %729 = vperm.xlu1 %1095, %v620_v20  }
 0x639   : > { %v711_v22 = vpop.permute.xlu1 %710 }
 0x63a   : > { %v713_v24 = vadd.f32 %v711_v22, %v703_v23 }
 0x63d   : > { %v721_v25 = vpop.permute.xlu1 %720 }
 0x63e   : > { %v723_v26 = vadd.f32 %v721_v25, %v713_v24 }
 0x640   : > { %v724_v27 = vadd.f32 1e-12, %v723_v26 }
 0x642   : > { %1113 = vlog2.f32 %v724_v27 }
 0x64a   : > { %v730_v30 = vpop.permute.xlu1 %729 }
 0x64f   : > { %v1114_v28 = vpop.eup %1113 }
 0x650   : > { %v726_v29 = vmul.f32 0.6931472, %v1114_v28 }
 0x652   : > { %v732_v31 = vmul.f32 %v730_v30, %v726_v29 }
 0x654   : > { %v733_v32 = vmul.f32 1.442695, %v732_v31 }
 0x656   : > { %1115 = vpow2.f32 %v733_v32 }
 0x663   : > { %v1116_v33 = vpop.eup %1115 }
 0x664   : > { %v735_v34 = vsel %vm625_vm4, %v1116_v33, 0.0 }
 0x665   : > { %736 = vadd.xlane.f32.xlu0 %v735_v34 }
 0x6ee   : > { %v737_v37 = vpop.xlane.xlu0 %736 }
 0x6ef   : > { %1117 = vrcp.f32 %v737_v37 }
 0x6f0   : > { %1119 = vpow2.f32 %v981_v49 }
 0x6f1   : > { %1121 = vpow2.f32 %v982_v50 }
 0x6fc   : > { %v1118_v38 = vpop.eup %1117 }
 0x6fd   : > { %v739_v40 = vmul.f32 %v1118_v38, %v1116_v33  ;;  %v1120_v51 = vpop.eup %1119 }
 0x6fe   : > { %v582_v52 = vadd.f32 1.0, %v1120_v51  ;;  %v1122_v53 = vpop.eup %1121 }
 0x6ff   : > { %825 = vrot.lane.b32.xlu1 %v739_v40, %s1169_s30  ;;  %1039 = vmatmul.mubr.msk.f32.vlgmr.msra.gmra.mxu1 %vm625_vm4, %v739_v40  ;;  %v588_v54 = vadd.f32 1.0, %v1122_v53 }
 0x700   : > { %1123 = vrcp.f32 %v582_v52 }
 0x701   : > { %1125 = vrcp.f32 %v588_v54 }
 0x70d   : > { %v1124_v39 = vpop.eup %1123 }
 0x70e   : > { %v1126_v59 = vpop.eup %1125 }
 0x771   : > { %v826_v42 = vpop.permute.xlu1 %825 }
 0x772   : > { %829 = vst.msk [vmem:[%s1244_s10] sm:$0xff] %vm828_vm6, %v826_v42 }
 0x7bf   : > { %v811_v55 = vpop.f32.mrf.mxu1 }
 0x7c0   : > { %v815_v56 = vmul.f32 %v1124_v39, %v811_v55  ;;  %v818_v44 = vmul.f32 %v1126_v59, %v811_v55 }
 0x7c1   : > { %v1040_v57 = vpop.f32.mrf.mxu1 }
 0x7c2   : > { %v816_v58 = vsub.f32 1.0, %v815_v56 }
 0x7c4   : > { %v817_v60 = vmul.f32 %v816_v58, %v298_v41 }
 0x7c6   : > { %v819_v61 = vadd.f32 %v818_v44, %v817_v60 }
 0x7c8   : > { %830 = vst [vmem:[%s1244_s10 + $0x8] sm:$0xff] %v819_v61 }
 0x7c9 PF: > { %s16_s22 = sadd.s32 1, %s1165_s22   ;;  %s1404_s18 = smov %s1157_s20 }
 0x7ca   : > { %p13_p8 = scmp.ge.s32.totalorder %s16_s22, 18   ;;  %s1405_s19 = smov %s1161_s21 }
 0x7cb   : > { %s1406_s20 = smov %s1409_s23  ;;  %s1407_s21 = smov %s1413_s24 }
 0x7cc   :  { %15 = sbr.rel (!%p13_p8) target bundleno = 3 (0x3), region = 86 }

</bundles_post_ra>
